<compile_context>
chip_gen: v7x
topology: tpu7x:2x2x1
jax: 0.10.0
libtpu: 0.0.40
codegen_flags: <defaults>
</compile_context>

<pallas_src>
import functools

import jax
import jax.numpy as jnp
from jax import lax
from jax.experimental import pallas as pl
from jax.experimental.pallas import tpu as pltpu

HIDDEN = 128          # follower MLP hidden width (one full lane vector)
SLAB_ROWS = 8         # pad fused weights to one full f32 vreg (8, 128)


# -----------------------------------------------------------------------------
# Kernels
# -----------------------------------------------------------------------------
def fwd_grad_kernel(price_ref, bias_ref, w_ref, obj_ref, grad_ref):
    """Fused forward + analytic d(obj)/d(price).

    price_ref: SMEM (1,)  leader price
    bias_ref : SMEM (1,)  folded bias  b2' = 0.3 * b2
    w_ref    : VMEM (8, HIDDEN) slab; rows = [w1_price, date*w1_date+b1, 0.3*w2, 0...]
    obj_ref  : VMEM (1, 1) objective
    grad_ref : VMEM (1, 1) d(objective)/d(price)
    """
    p = price_ref[0]
    b2p = bias_ref[0]

    w = w_ref[...]                      # one aligned full-vreg load
    w0 = w[0:1, :]                      # d(pre)/dp row
    c = w[1:2, :]                       # folded date*w1_date + b1 row
    w2 = w[2:3, :]                      # folded 0.3 * w2 row

    # frozen follower: relu(p*w0 + c) . w2  + b2'   (all pre-scaled by 0.3)
    pre = p * w0 + c                                              # VPU FMA
    h = jnp.maximum(pre, 0.0)
    fp3 = jnp.sum(h * w2, axis=-1, keepdims=True) + b2p           # XLU reduce
    # d(fp3)/dp with ReLU subgradient(0) = 0 (matches PyTorch)
    dfp3 = jnp.sum(jnp.where(pre > 0.0, w0 * w2, 0.0),
                   axis=-1, keepdims=True)                        # XLU reduce

    # leader objective: -((p - 1) * (2 - p + 0.3 * follower_price))
    obj_ref[...] = -((p - 1.0) * (2.0 - p + fp3))
    grad_ref[...] = -((2.0 - p + fp3) + (p - 1.0) * (dfp3 - 1.0))


def train_kernel(num_steps, price_ref, hyper_ref, w_ref, price_out_ref, obj_out_ref):
    """K fused gradient-descent steps in a single pallas_call.

    price_ref : VMEM (1, 1) initial leader price
    hyper_ref : SMEM (2,)   = [b2', learning_rate]
    w_ref     : VMEM (8, HIDDEN) fused weight slab (DMA'd once)
    outputs   : final price (1,1), final objective (1,1)
    """
    b2p = hyper_ref[0]
    lr = hyper_ref[1]

    w = w_ref[...]
    w0 = w[0:1, :]
    c = w[1:2, :]
    w2 = w[2:3, :]

    def step(_, p):                               # p: (1, 1) running price
        pre = p * w0 + c
        h = jnp.maximum(pre, 0.0)
        fp3 = jnp.sum(h * w2, axis=-1, keepdims=True) + b2p
        dfp3 = jnp.sum(jnp.where(pre > 0.0, w0 * w2, 0.0),
                       axis=-1, keepdims=True)
        dobj = -((2.0 - p + fp3) + (p - 1.0) * (dfp3 - 1.0))
        return p - lr * dobj

    p = lax.fori_loop(0, num_steps, step, price_ref[...])

    # final objective at the trained price
    pre = p * w0 + c
    h = jnp.maximum(pre, 0.0)
    fp3 = jnp.sum(h * w2, axis=-1, keepdims=True) + b2p
    price_out_ref[...] = p
    obj_out_ref[...] = -((p - 1.0) * (2.0 - p + fp3))


# -----------------------------------------------------------------------------
# Wrappers
# -----------------------------------------------------------------------------
def _fwd_grad_call(leader_price, bias, fused_weights):
    obj, grad = pl.pallas_call(
        fwd_grad_kernel,
        out_shape=(jax.ShapeDtypeStruct((1, 1), jnp.float32),
                   jax.ShapeDtypeStruct((1, 1), jnp.float32)),
        in_specs=[
            pl.BlockSpec(memory_space=pltpu.MemorySpace.SMEM),   # leader price
            pl.BlockSpec(memory_space=pltpu.MemorySpace.SMEM),   # folded bias
            pl.BlockSpec(memory_space=pltpu.MemorySpace.VMEM),   # weight slab
        ],
        out_specs=(pl.BlockSpec(memory_space=pltpu.MemorySpace.VMEM),
                   pl.BlockSpec(memory_space=pltpu.MemorySpace.VMEM)),
    )(leader_price, bias, fused_weights)
    return obj.reshape(1), grad.reshape(1)


@jax.custom_vjp
def price_optimizer_forward(leader_price, bias, fused_weights):
    """leader_price: (1,) f32; bias: (1,) f32 = [0.3*b2]; fused_weights: (8,HIDDEN) f32.
    Returns the (1,)-shaped objective, matching the PyTorch module's output."""
    obj, _ = _fwd_grad_call(leader_price, bias, fused_weights)
    return obj


def _forward_fwd(leader_price, bias, fused_weights):
    obj, grad = _fwd_grad_call(leader_price, bias, fused_weights)
    return obj, grad


def _forward_bwd(grad, g):
    # frozen follower + frozen constants -> zero cotangents for bias / weights
    return (g * grad,
            jnp.zeros((1,), jnp.float32),
            jnp.zeros((SLAB_ROWS, HIDDEN), jnp.float32))


price_optimizer_forward.defvjp(_forward_fwd, _forward_bwd)


def price_optimizer_train(leader_price, bias, fused_weights, *, lr, num_steps):
    """Fuse `num_steps` gradient-descent steps on leader_price into ONE kernel."""
    hyper = jnp.concatenate([bias, jnp.array([lr], jnp.float32)])          # (2,)
    price0 = leader_price.reshape(1, 1)
    price, obj = pl.pallas_call(
        functools.partial(train_kernel, num_steps),
        out_shape=(jax.ShapeDtypeStruct((1, 1), jnp.float32),
                   jax.ShapeDtypeStruct((1, 1), jnp.float32)),
        in_specs=[
            pl.BlockSpec(memory_space=pltpu.MemorySpace.VMEM),   # initial price
            pl.BlockSpec(memory_space=pltpu.MemorySpace.SMEM),   # [b2', lr]
            pl.BlockSpec(memory_space=pltpu.MemorySpace.VMEM),   # weight slab
        ],
        out_specs=(pl.BlockSpec(memory_space=pltpu.MemorySpace.VMEM),
                   pl.BlockSpec(memory_space=pltpu.MemorySpace.VMEM)),
    )(price0, hyper, fused_weights)
    return price.reshape(1), obj.reshape(1)


# -----------------------------------------------------------------------------
# Pack-time constant folding (done ONCE per model, never per call)
# -----------------------------------------------------------------------------
def pack_params(w1, b1, w2, b2, date=None):
    """Fold the frozen follower + constants into a (8,HIDDEN) slab and a scalar.

    Rows: [ w1_price_row,  date*w1_date_row + b1 (or just b1),  0.3*w2,  zeros... ]
    bias: [ 0.3 * b2 ]
    """
    w0 = w1[0:1, :]
    if date is None:
        c = b1
    else:
        c = jnp.float32(date) * w1[1:2, :] + b1
    w2p = 0.3 * w2
    slab = jnp.zeros((SLAB_ROWS, HIDDEN), jnp.float32)
    slab = slab.at[0:1, :].set(w0).at[1:2, :].set(c).at[2:3, :].set(w2p)
    bias = jnp.reshape(0.3 * b2, (1,)).astype(jnp.float32)
    return slab, bias


def make_follower_params(key):
    """Deterministic synthetic frozen follower MLP (un-fused, original form)."""
    k1, k2, k3, k4 = jax.random.split(key, 4)
    w1 = 0.1 * jax.random.normal(k1, (2, HIDDEN), jnp.float32)   # rows: price, date
    b1 = 0.1 * jax.random.normal(k2, (1, HIDDEN), jnp.float32)
    w2 = 0.1 * jax.random.normal(k3, (1, HIDDEN), jnp.float32)
    b2 = 0.1 * jax.random.normal(k4, (), jnp.float32)
    return w1, b1, w2, b2


# -----------------------------------------------------------------------------
# Pure-JAX reference (original, un-folded PyTorch form)
# -----------------------------------------------------------------------------
def reference_forward(leader_price, date, w1, b1, w2, b2):
    p = leader_price[0]
    if date is None:
        inp = jnp.reshape(p, (1, 1))
    else:
        inp = jnp.stack([p, jnp.float32(date)]).reshape(1, 2)
    h = jnp.maximum(inp @ w1 + b1, 0.0)
    fp = jnp.sum(h * w2, axis=-1, keepdims=True) + b2
    pr = leader_price.reshape(1, 1)
    return (-((pr - 1.0) * (2.0 - pr + 0.3 * fp))).reshape(1)


if __name__ == "__main__":
    key = jax.random.PRNGKey(0)
    w1, b1, w2, b2 = make_follower_params(key)

    date = 0.5
    leader_price = jnp.array([1.5], dtype=jnp.float32)            # init_price = 1.5

    # one-time pack (frozen model + frozen date): hoisted out of every call
    fused_weights, bias = pack_params(w1, b1, w2, b2, date)
    fused_weights = jax.device_put(fused_weights)
    bias = jax.device_put(bias)

    # --- forward ---
    out = price_optimizer_forward(leader_price, bias, fused_weights)
    out = jax.block_until_ready(out)
    ref = reference_forward(leader_price, date, w1, b1, w2, b2)
    assert out.shape == (1,)
    assert jnp.allclose(out, ref, atol=1e-5, rtol=1e-5), (out, ref)

    # --- gradient via custom_vjp (fused analytic grad, same kernel launch) ---
    kernel_loss = lambda p: price_optimizer_forward(p, bias, fused_weights)[0]
    ref_loss = lambda p: reference_forward(p, date, w1, b1, w2, b2)[0]
    g_kernel = jax.block_until_ready(jax.grad(kernel_loss)(leader_price))
    g_ref = jax.grad(ref_loss)(leader_price)
    assert jnp.allclose(g_kernel, g_ref, atol=1e-4, rtol=1e-4), (g_kernel, g_ref)

    # --- fully fused K-step optimization loop in ONE pallas_call ---
    LR, STEPS = 0.05, 20
    p_trained, obj_trained = price_optimizer_train(
        leader_price, bias, fused_weights, lr=LR, num_steps=STEPS)
    p_trained = jax.block_until_ready(p_trained)
    obj_trained = jax.block_until_ready(obj_trained)

    grad_ref_fn = jax.jit(jax.grad(ref_loss))
    p_ref = leader_price
    for _ in range(STEPS):
        p_ref = p_ref - LR * grad_ref_fn(p_ref)
    obj_ref_trained = reference_forward(p_ref, date, w1, b1, w2, b2)
    assert jnp.allclose(p_trained, p_ref, atol=1e-3, rtol=1e-3), (p_trained, p_ref)
    assert jnp.allclose(obj_trained, obj_ref_trained, atol=1e-3, rtol=1e-3), (
        obj_trained, obj_ref_trained)

    print("KERNEL_OK")
</pallas_src>

<mosaic_0001>
module attributes {stable_mosaic.version = 11 : i64} {
  func.func @fwd_grad_kernel(%arg0: memref<1xf32, #tpu.memory_space<smem>>, %arg1: memref<1xf32, #tpu.memory_space<smem>>, %arg2: memref<8x128xf32, #tpu.memory_space<vmem>>, %arg3: memref<1x1xf32, #tpu.memory_space<vmem>>, %arg4: memref<1x1xf32, #tpu.memory_space<vmem>>) attributes {dimension_semantics = [], scalar_prefetch = 0 : i64, scratch_operands = 0 : i64, tpu.core_type = #tpu.core_type<tc>} {
    %c0 = arith.constant 0 : index
    %0 = memref.load %arg0[%c0] : memref<1xf32, #tpu.memory_space<smem>>
    %c0_0 = arith.constant 0 : index
    %1 = memref.load %arg1[%c0_0] : memref<1xf32, #tpu.memory_space<smem>>
    %c0_1 = arith.constant 0 : index
    %c0_2 = arith.constant 0 : index
    %2 = vector.load %arg2[%c0_1, %c0_2] : memref<8x128xf32, #tpu.memory_space<vmem>>, vector<8x128xf32>
    %3 = vector.extract_strided_slice %2 {offsets = [0, 0], sizes = [1, 128], strides = [1, 1]} : vector<8x128xf32> to vector<1x128xf32>
    %4 = vector.extract_strided_slice %2 {offsets = [1, 0], sizes = [1, 128], strides = [1, 1]} : vector<8x128xf32> to vector<1x128xf32>
    %5 = vector.extract_strided_slice %2 {offsets = [2, 0], sizes = [1, 128], strides = [1, 1]} : vector<8x128xf32> to vector<1x128xf32>
    %6 = vector.broadcast %0 : f32 to vector<1x128xf32>
    %7 = arith.mulf %6, %3 : vector<1x128xf32>
    %8 = arith.addf %7, %4 : vector<1x128xf32>
    %cst = arith.constant 0.000000e+00 : f32
    %9 = vector.broadcast %cst : f32 to vector<1x128xf32>
    %10 = arith.maximumf %8, %9 : vector<1x128xf32>
    %11 = arith.mulf %10, %5 : vector<1x128xf32>
    %cst_3 = arith.constant dense<0.000000e+00> : vector<1xf32>
    %12 = vector.multi_reduction <add>, %11, %cst_3 [1] : vector<1x128xf32> to vector<1xf32>
    %13 = vector.shape_cast %12 : vector<1xf32> to vector<1x1xf32>
    %14 = vector.broadcast %1 : f32 to vector<1x1xf32>
    %15 = arith.addf %13, %14 : vector<1x1xf32>
    %cst_4 = arith.constant 0.000000e+00 : f32
    %16 = vector.broadcast %cst_4 : f32 to vector<1x128xf32>
    %17 = arith.cmpf ogt, %8, %16 : vector<1x128xf32>
    %18 = arith.mulf %3, %5 : vector<1x128xf32>
    %cst_5 = arith.constant 0.000000e+00 : f32
    %19 = vector.broadcast %cst_5 : f32 to vector<1x128xf32>
    %20 = arith.select %17, %18, %19 : vector<1x128xi1>, vector<1x128xf32>
    %cst_6 = arith.constant dense<0.000000e+00> : vector<1xf32>
    %21 = vector.multi_reduction <add>, %20, %cst_6 [1] : vector<1x128xf32> to vector<1xf32>
    %22 = vector.shape_cast %21 : vector<1xf32> to vector<1x1xf32>
    %cst_7 = arith.constant 1.000000e+00 : f32
    %23 = arith.subf %0, %cst_7 : f32
    %cst_8 = arith.constant 2.000000e+00 : f32
    %24 = arith.subf %cst_8, %0 : f32
    %25 = vector.broadcast %24 : f32 to vector<1x1xf32>
    %26 = arith.addf %25, %15 : vector<1x1xf32>
    %27 = vector.broadcast %23 : f32 to vector<1x1xf32>
    %28 = arith.mulf %27, %26 : vector<1x1xf32>
    %cst_9 = arith.constant 0.000000e+00 : f32
    %29 = vector.broadcast %cst_9 : f32 to vector<1x1xf32>
    %30 = arith.subf %29, %28 : vector<1x1xf32>
    %c0_10 = arith.constant 0 : index
    %c0_11 = arith.constant 0 : index
    %31 = vector.load %arg3[%c0_10, %c0_11] : memref<1x1xf32, #tpu.memory_space<vmem>>, vector<1x1xf32>
    tpu.vector_store %arg3[%c0_10, %c0_11], %30 {strides = array<i32>} : memref<1x1xf32, #tpu.memory_space<vmem>>, vector<1x1xf32>,
    %cst_12 = arith.constant 2.000000e+00 : f32
    %32 = arith.subf %cst_12, %0 : f32
    %33 = vector.broadcast %32 : f32 to vector<1x1xf32>
    %34 = arith.addf %33, %15 : vector<1x1xf32>
    %cst_13 = arith.constant 1.000000e+00 : f32
    %35 = arith.subf %0, %cst_13 : f32
    %cst_14 = arith.constant 1.000000e+00 : f32
    %36 = vector.broadcast %cst_14 : f32 to vector<1x1xf32>
    %37 = arith.subf %22, %36 : vector<1x1xf32>
    %38 = vector.broadcast %35 : f32 to vector<1x1xf32>
    %39 = arith.mulf %38, %37 : vector<1x1xf32>
    %40 = arith.addf %34, %39 : vector<1x1xf32>
    %cst_15 = arith.constant 0.000000e+00 : f32
    %41 = vector.broadcast %cst_15 : f32 to vector<1x1xf32>
    %42 = arith.subf %41, %40 : vector<1x1xf32>
    %c0_16 = arith.constant 0 : index
    %c0_17 = arith.constant 0 : index
    %43 = vector.load %arg4[%c0_16, %c0_17] : memref<1x1xf32, #tpu.memory_space<vmem>>, vector<1x1xf32>
    tpu.vector_store %arg4[%c0_16, %c0_17], %42 {strides = array<i32>} : memref<1x1xf32, #tpu.memory_space<vmem>>, vector<1x1xf32>,
    return
  }
}

</mosaic_0001>

<bundles_post_ra>
// kernel: tpu_custom_call.1
= control target key start
LH: loop header
LB: loop body
LE: loop exit
PB: predicated region body
PF: predicated region fallthrough
CT: control target
= control target key end

     0   :  { %12 = vsyncpa [#allocation5], 0  ;;  %s255_s0 = inlined_call_operand.<no memory space> [shape: f32[1], index: 0, kind: input, shape index: {}]   ;;  %s256_s1 = inlined_call_operand.<no memory space> [shape: f32[1], index: 1, kind: input, shape index: {}]   ;;  %s257_s2 = inlined_call_operand.hbm [shape: f32[8,128], index: 2, kind: input, shape index: {}]   ;;  %s258_s3 = inlined_call_operand.hbm [shape: f32[1,1], index: 3, kind: output, shape index: {0}]   ;;  %s259_s4 = inlined_call_operand.hbm [shape: f32[1,1], index: 4, kind: output, shape index: {1}]  }
   0x1   :  { %13 = vsyncpa [#allocation6], 0 }
   0x2   :  { %14 = vsyncpa [#allocation9], 0  ;;  %s177_s15 = smov [#allocation4]   ;;  %s105_s19 = scalar_lea.hbm %s257_s2, 128 }
   0x3   :  { %s25_s16 = sshll.u32 %s177_s15, 4  ;;  %p106_p0 = scmp.ne.s32.totalorder %s257_s2, %s105_s19  ;;  %s26_s16 = int_to_ptr.vmem [resolvable:$true] %s25_s16 }
   0x4   :  { %p109_p1 = scmp.lt.u32.totalorder %s105_s19, %s257_s2 }
   0x6   :  { %p111_p2 = pnand %p109_p1, %p106_p0 }
   0x8   :  { %114 = shalt.err (!%p111_p2)
}
   0x9   :  { %s115_s24 = scalar_lea.vmem %s26_s16, 128  ;;  %p120_p4 = scmp.lt.s32.totalorder %s26_s16, %s26_s16 }
   0xa   :  { %p116_p3 = scmp.ne.s32.totalorder %s26_s16, %s115_s24  ;;  %p121_p5 = scmp.lt.s32.totalorder %s115_s24, %s115_s24 }
   0xc   :  { %p122_p6 = por %p121_p5, %p120_p4 }
   0xe   :  { %p123_p7 = pnand %p122_p6, %p116_p3 }
  0x10   :  { %126 = shalt.err (!%p123_p7)
}
  0x11   :  { %28 = dma.hbm_to_vmem [thread:$0]  %s257_s2, 128, %s26_s16, [#allocation5]  }
  0x12   :  { %171 = dma.done.wait [#allocation5], 128  }
  0x13   :  { %172 = vsyncadd [#allocation5], 4294967168  ;;  %v35_v0 = vstv %s255_s0  ;;  %v34_v1 = vld [vmem:[#allocation4] sm:$0xff]  ;;  %vm45_vm1 = vcmask 1040384   ;;  %s58_s30 = ssub.f32 2.0, %s255_s0  ;;  %v49_v12 = vstv %s256_s1  ;;  %s178_s10 = smov [#allocation7]  }
  0x14   :  { %v36_v2 = vmul.f32 %v35_v0, %v34_v1  ;;  %v38_v3 = vrot.slane %v34_v1, 1  ;;  %v42_v4 = vrot.slane %v34_v1, 2  ;;  %s100_s9 = sadd.f32 -1.0, %s255_s0  ;;  %s77_s11 = sshll.u32 %s178_s10, 4  ;;  %vm64_vm2 = vcmask 0   ;;  %s78_s11 = int_to_ptr.vmem [resolvable:$true] %s77_s11 }
  0x15   :  { %v59_v13 = vstv %s58_s30  ;;  %s179_s12 = smov [#allocation8]   ;;  %s127_s0 = scalar_lea.vmem %s78_s11, 16 }
  0x16   :  { %v40_v5 = vadd.f32 %v38_v3, %v36_v2  ;;  %v52_v6 = vmul.f32 %v42_v4, %v34_v1  ;;  %v61_v16 = vstv %s100_s9  ;;  %s87_s1 = sshll.u32 %s179_s12, 4  ;;  %p128_p8 = scmp.ne.s32.totalorder %s78_s11, %s127_s0  ;;  %s88_s1 = int_to_ptr.vmem [resolvable:$true] %s87_s1 }
  0x17   :  { %s131_s13 = scalar_lea.vmem %s78_s11, 32  ;;  %p132_p9 = scmp.lt.s32.totalorder %s78_s11, %s78_s11 }
  0x18   :  { %v41_v7 = vmax.f32 %v40_v5, 0.0  ;;  %vm51_vm0 = vcmp.gt.f32.partialorder %v40_v5, 0.0  ;;  %p133_p10 = scmp.lt.s32.totalorder %s131_s13, %s127_s0 }
  0x19   :  { %v53_v9 = vsel %vm51_vm0, %v52_v6, 0.0 }
  0x1a   :  { %v44_v8 = vmul.f32 %v42_v4, %v41_v7  ;;  %v54_v11 = vsel %vm45_vm1, %v53_v9, 0.0  ;;  %p134_p11 = por %p133_p10, %p132_p9 }
  0x1c   :  { %v46_v10 = vsel %vm45_vm1, %v44_v8, 0.0  ;;  %p135_p12 = pnand %p134_p11, %p128_p8 }
  0x1d   :  { %47 = vadd.xlane.f32.xlu0 %v46_v10 }
  0x21   :  { %55 = vadd.xlane.f32.xlu0 %v54_v11 }
  0xaa   :  { %v48_v14 = vpop.xlane.xlu0 %47 }
  0xab   :  { %v50_v15 = vadd.f32 %v49_v12, %v48_v14 }
  0xad   :  { %v60_v17 = vadd.f32 %v59_v13, %v50_v15 }
  0xae   :  { %v56_v18 = vpop.xlane.xlu0 %55 }
  0xaf   :  { %v62_v19 = vmul.f32 %v61_v16, %v60_v17  ;;  %v101_v20 = vadd.f32 -1.0, %v56_v18 }
  0xb1   :  { %v63_v21 = vsub.f32 0.0, %v62_v19  ;;  %v67_v22 = vmul.f32 %v101_v20, %v61_v16 }
  0xb3   :  { %v68_v23 = vadd.f32 %v67_v22, %v60_v17  ;;  %65 = vst.msk [vmem:[#allocation7] sm:$0x1] %vm64_vm2, %v63_v21 }
  0xb4   :  { %138 = shalt.err (!%p135_p12)
}
  0xb5   :  { %s139_s16 = scalar_lea.hbm %s258_s3, 16 }
  0xb6   :  { %p140_p13 = scmp.ne.s32.totalorder %s258_s3, %s139_s16  ;;  %p143_p0 = scmp.lt.u32.totalorder %s139_s16, %s258_s3 }
  0xb8   :  { %p145_p1 = pnand %p143_p0, %p140_p13 }
  0xba   :  { %148 = shalt.err (!%p145_p1)
}
  0xbb   :  { %80 = dma.vmem_to_hbm [thread:$0]  %s78_s11, 16, %s258_s3, [#allocation6]   ;;  %v69_v24 = vsub.f32 0.0, %v68_v23 }
  0xbc   :  { %s149_s23 = scalar_lea.vmem %s88_s1, 16  ;;  %s153_s24 = scalar_lea.vmem %s88_s1, 32 }
  0xbd   :  { %70 = vst.msk [vmem:[#allocation8] sm:$0x1] %vm64_vm2, %v69_v24  ;;  %p150_p2 = scmp.ne.s32.totalorder %s88_s1, %s149_s23  ;;  %p154_p3 = scmp.lt.s32.totalorder %s88_s1, %s88_s1 }
  0xbe   :  { %p155_p4 = scmp.lt.s32.totalorder %s153_s24, %s149_s23 }
  0xc0   :  { %p156_p5 = por %p155_p4, %p154_p3 }
  0xc2   :  { %p157_p6 = pnand %p156_p5, %p150_p2 }
  0xc4   :  { %160 = shalt.err (!%p157_p6)
}
  0xc5   :  { %s161_s27 = scalar_lea.hbm %s259_s4, 16 }
  0xc6   :  { %p162_p7 = scmp.ne.s32.totalorder %s259_s4, %s161_s27  ;;  %p165_p8 = scmp.lt.u32.totalorder %s161_s27, %s259_s4 }
  0xc8   :  { %p167_p9 = pnand %p165_p8, %p162_p7 }
  0xca   :  { %170 = shalt.err (!%p167_p9)
}
  0xcb   :  { %90 = dma.vmem_to_hbm [thread:$0]  %s88_s1, 16, %s259_s4, [#allocation9]  }
  0xcc   :  { %173 = dma.done.wait [#allocation6], 16  }
  0xcd   :  { %174 = vsyncadd [#allocation6], 4294967280 }
  0xce   :  { %175 = dma.done.wait [#allocation9], 16  }
  0xcf   :  { %176 = vsyncadd [#allocation9], 4294967280 }
  0xd0   :  { %97 = vsyncpa [#allocation5], 1 }
  0xd1   :  { %98 = vsyncpa [#allocation6], 1 }
  0xd2   :  { %99 = vsyncpa [#allocation9], 1 }

</bundles_post_ra>
